<compile_context>
chip_gen: v5e
topology: v5e:2x2
jax: 0.10.0
libtpu: 0.0.40
codegen_flags: <defaults>
</compile_context>

<pallas_src>
import functools

import jax
import jax.numpy as jnp
from jax.experimental import pallas as pl
from jax.experimental.pallas import tpu as pltpu


def _codebook_kernel(x_ref, embed_ref, half_e_sq_ref, q_ref, idx_ref, *,
                     bf16_score):
    x = x_ref[...]                                   # (tn, D)  native dtype
    e = embed_ref[...]                               # (K,  D)  native dtype
    tn = x.shape[0]
    k = e.shape[0]
    sub, lanes = idx_ref.shape                       # (8, tn // 8)

    if bf16_score:
        xs = x.astype(jnp.bfloat16)
        es = e.astype(jnp.bfloat16)
    else:
        xs, es = x, e

    # Nearest-code score.  argmax_k of -||x - e_k||^2 == argmax_k of
    # (x . e_k - 0.5*||e_k||^2); the per-row ||x||^2 term never changes the
    # winner, so it is dropped.  MXU matmul with f32 accumulation; the
    # contraction is expressed directly (no explicit e.T materialization).
    dots = jax.lax.dot_general(xs, es, (((1,), (1,)), ((), ())),
                               preferred_element_type=jnp.float32)   # (tn, K)
    score = dots - half_e_sq_ref[...]                                # (tn, K)

    # Argmax in a (8, lanes, K) view so the index tile comes out directly in
    # (8, lanes) form.  lanes is a multiple of 8 (wrapper guarantees it), so
    # this reshape does not move data across lanes/sublanes.
    score3 = score.reshape(sub, lanes, k)
    code_iota = jax.lax.broadcasted_iota(jnp.int32, (1, 1, k), 2)    # broadcast
    row_max = jnp.max(score3, axis=-1, keepdims=True)                # (8,lanes,1)
    # First-max-wins tie-break (matches argmax semantics of the reference).
    # Rows whose scores are all-NaN (garbage in the ragged last block, or NaN
    # inputs) fall through to the `k` sentinel: all-zero one-hot, quantize 0.
    # Those rows are masked on writeback / sliced off by the wrapper.
    idx2d = jnp.min(
        jnp.where(score3 == row_max, code_iota, k), axis=-1
    ).astype(jnp.int32)                                              # (8, lanes)

    # Exact one-hot gather of the codebook rows on the MXU.  One-hot is built
    # in the codebook dtype (bf16 stays bf16), accumulation in f32.
    onehot = (code_iota == idx2d[:, :, None]).astype(e.dtype)        # (8,lanes,K)
    quantize = jnp.dot(
        onehot.reshape(tn, k), e, preferred_element_type=jnp.float32
    )                                                                # (tn, D)

    q_ref[...] = quantize.astype(q_ref.dtype)
    idx_ref[...] = idx2d                                             # dense store


def _round_up(a, m):
    return (a + m - 1) // m * m


def euclidean_codebook_forward(x, embed, *, tile_n=2048, bf16_score=False):
    """Eval-mode forward of EuclideanCodebook.

    Returns (quantize, num_replace, embed_ind); the PyTorch module returns
    (quantize, num_replace) and computes embed_ind internally.

    bf16_score=True casts only the distance matmul to bf16 (v6e/v7x MXU fast
    path); may flip the winning code on near-ties vs. the f32 reference.
    """
    assert tile_n % 8 == 0, "tile_n must be a multiple of 8 sublanes"
    orig_shape = x.shape
    dim = orig_shape[-1]
    flatten = x.reshape(-1, dim)
    n_tokens = flatten.shape[0]
    k = embed.shape[0]

    # Tile-size policy:
    #  * quantum 64 rows -> lanes = tile_n/8 stays a multiple of 8 sublanes
    #    (keeps the in-kernel reshape a layout no-op).
    #  * never larger than the rounded-up token count (no wasted giant block).
    #  * once there is enough work, keep >= 2 grid steps so both v7x
    #    TensorCores get a share under dimension_semantics=("parallel",).
    tile_q = 64
    tile_n = min(tile_n, _round_up(n_tokens, tile_q))
    if n_tokens > 1024:
        tile_n = min(tile_n, max(512, _round_up(pl.cdiv(n_tokens, 2), tile_q)))
    tile_n = max(tile_q, _round_up(tile_n, tile_q))

    grid_n = pl.cdiv(n_tokens, tile_n)
    sub = 8
    lanes = tile_n // sub

    # Hoisted once per call; a (1, K) f32 row that stays VMEM-resident
    # (constant index_map) instead of being recomputed every grid step.
    half_e_sq = (0.5 * jnp.sum(embed.astype(jnp.float32) ** 2, axis=-1))[None, :]

    kern = functools.partial(_codebook_kernel, bf16_score=bf16_score)

    # No wrapper-side padding: the last token block may be ragged; Pallas
    # masks its writeback and the kernel tolerates garbage in the padded rows.
    quantize, idx = pl.pallas_call(
        kern,
        out_shape=(
            jax.ShapeDtypeStruct((n_tokens, dim), embed.dtype),
            jax.ShapeDtypeStruct((grid_n * sub, lanes), jnp.int32),
        ),
        grid=(grid_n,),
        in_specs=[
            pl.BlockSpec((tile_n, dim), lambda i: (i, 0)),
            pl.BlockSpec((k, dim), lambda i: (0, 0)),
            pl.BlockSpec((1, k), lambda i: (0, 0)),
        ],
        out_specs=(
            pl.BlockSpec((tile_n, dim), lambda i: (i, 0)),
            pl.BlockSpec((sub, lanes), lambda i: (i, 0)),
        ),
        compiler_params=pltpu.CompilerParams(
            dimension_semantics=("parallel",)),
        # Working set at tile_n=2048, K=128 is only a few MiB, well under the
        # v5e 16 MiB scoped-VMEM default; set vmem_limit_bytes here if tile_n
        # or K are raised substantially.
    )(flatten, embed, half_e_sq)

    quantize = quantize.reshape(orig_shape)
    # idx tile (i) rows [i*8, i*8+8) flattened row-major are exactly the token
    # order of block i: token t of block i lives at row t // lanes, col
    # t % lanes.  Only this tiny int32 array is sliced to drop ragged padding.
    embed_ind = idx.reshape(-1)[:n_tokens].reshape(orig_shape[:-1])

    num_replace = 0  # eval mode: no EMA update, no kmeans init, no code expiry
    return quantize, num_replace, embed_ind


def _reference_forward(x, embed):
    """Pure-JAX reference mirroring the PyTorch forward (full distance)."""
    dim = x.shape[-1]
    flatten = x.reshape(-1, dim).astype(jnp.float32)
    e = embed.astype(jnp.float32)
    distance = -(
        jnp.sum(flatten ** 2, axis=1, keepdims=True)
        - 2.0 * flatten @ e.T
        + jnp.sum(e ** 2, axis=1, keepdims=True).T
    )
    idx = jnp.argmax(distance, axis=-1)
    quantize = e[idx]
    return quantize.reshape(x.shape).astype(embed.dtype), idx.reshape(x.shape[:-1])


if __name__ == "__main__":
    # Module config (kmeans_init=False -> embed ~ randn(codebook_size, dim)).
    dim = 32
    codebook_size = 128

    key = jax.random.PRNGKey(0)
    k_embed, k_x, k_x2, k_x3 = jax.random.split(key, 4)
    embed = jax.random.normal(k_embed, (codebook_size, dim), dtype=jnp.float32)

    # Test 1: small channels-last input (batch=2, seq=16, dim=32), single tile.
    x = jax.random.normal(k_x, (2, 16, dim), dtype=jnp.float32)
    quantize, num_replace, idx = euclidean_codebook_forward(x, embed)
    quantize = jax.block_until_ready(quantize)
    idx = jax.block_until_ready(idx)

    q_ref, idx_ref = _reference_forward(x, embed)
    assert quantize.shape == x.shape
    assert jnp.array_equal(idx, idx_ref)
    assert jnp.allclose(quantize, q_ref, atol=1e-5, rtol=1e-5)
    assert num_replace == 0

    # Test 2: ragged token count + multiple grid steps (grid_n > 1, ragged
    # last block handled without any wrapper-side padding).
    x2 = jax.random.normal(k_x2, (3, 77, dim), dtype=jnp.float32)
    q2, nr2, idx2 = euclidean_codebook_forward(x2, embed, tile_n=128)
    q2 = jax.block_until_ready(q2)
    idx2 = jax.block_until_ready(idx2)
    q2_ref, idx2_ref = _reference_forward(x2, embed)
    assert q2.shape == x2.shape
    assert jnp.array_equal(idx2, idx2_ref)
    assert jnp.allclose(q2, q2_ref, atol=1e-5, rtol=1e-5)
    assert nr2 == 0

    # Test 3: larger token count -> exercises the auto tile-size heuristic
    # (>= 2 grid steps) and a ragged final block at the default tile_n.
    x3 = jax.random.normal(k_x3, (2, 600, dim), dtype=jnp.float32)
    q3, nr3, idx3 = euclidean_codebook_forward(x3, embed)
    q3 = jax.block_until_ready(q3)
    idx3 = jax.block_until_ready(idx3)
    q3_ref, idx3_ref = _reference_forward(x3, embed)
    assert q3.shape == x3.shape
    assert jnp.array_equal(idx3, idx3_ref)
    assert jnp.allclose(q3, q3_ref, atol=1e-5, rtol=1e-5)
    assert nr3 == 0

    print("KERNEL_OK")
</pallas_src>

<mosaic_0001>
module attributes {stable_mosaic.version = 11 : i64} {
  func.func @_codebook_kernel(%arg0: i32, %arg1: memref<64x32xf32, #tpu.memory_space<vmem>>, %arg2: memref<128x32xf32, #tpu.memory_space<vmem>>, %arg3: memref<1x128xf32, #tpu.memory_space<vmem>>, %arg4: memref<64x32xf32, #tpu.memory_space<vmem>>, %arg5: memref<8x8xi32, #tpu.memory_space<vmem>>) attributes {dimension_semantics = [#tpu.dimension_semantics<parallel>], iteration_bounds = array<i64: 1>, scalar_prefetch = 0 : i64, scratch_operands = 0 : i64, tpu.core_type = #tpu.core_type<tc>, window_params = [{transform_indices = @transform_0, window_bounds = array<i64: 64, 32>}, {pipeline_mode = #tpu.pipeline_mode<synchronous>, transform_indices = @transform_1, window_bounds = array<i64: 128, 32>}, {pipeline_mode = #tpu.pipeline_mode<synchronous>, transform_indices = @transform_2, window_bounds = array<i64: 1, 128>}, {transform_indices = @transform_3, window_bounds = array<i64: 64, 32>}, {transform_indices = @transform_4, window_bounds = array<i64: 8, 8>}]} {
    %c0 = arith.constant 0 : index
    %c0_0 = arith.constant 0 : index
    %0 = vector.load %arg1[%c0, %c0_0] : memref<64x32xf32, #tpu.memory_space<vmem>>, vector<64x32xf32>
    %c0_1 = arith.constant 0 : index
    %c0_2 = arith.constant 0 : index
    %1 = vector.load %arg2[%c0_1, %c0_2] : memref<128x32xf32, #tpu.memory_space<vmem>>, vector<128x32xf32>
    %cst = arith.constant dense<0.000000e+00> : vector<64x128xf32>
    %2 = tpu.matmul %0, %1, %cst {dimension_numbers = #tpu.dot_dimension_numbers<[1], [1], [0], [0], [0, 0, 1, 0], [], []>} : vector<64x32xf32>, vector<128x32xf32>, vector<64x128xf32> -> vector<64x128xf32>
    %c0_3 = arith.constant 0 : index
    %c0_4 = arith.constant 0 : index
    %3 = vector.load %arg3[%c0_3, %c0_4] : memref<1x128xf32, #tpu.memory_space<vmem>>, vector<1x128xf32>
    %4 = vector.broadcast %3 : vector<1x128xf32> to vector<64x128xf32>
    %5 = arith.subf %2, %4 : vector<64x128xf32>
    %6 = vector.shape_cast %5 : vector<64x128xf32> to vector<8x8x128xf32>
    %7 = tpu.iota {dimensions = array<i32: 2>} : vector<1x1x128xi32>
    %cst_5 = arith.constant dense<0xFF800000> : vector<8x8xf32>
    %8 = vector.multi_reduction <maximumf>, %6, %cst_5 [2] : vector<8x8x128xf32> to vector<8x8xf32>
    %9 = vector.shape_cast %8 : vector<8x8xf32> to vector<8x8x1xf32>
    %10 = vector.broadcast %9 : vector<8x8x1xf32> to vector<8x8x128xf32>
    %11 = arith.cmpf oeq, %6, %10 : vector<8x8x128xf32>
    %c128_i32 = arith.constant 128 : i32
    %12 = vector.shape_cast %7 : vector<1x1x128xi32> to vector<1x1x128xi32>
    %13 = vector.broadcast %12 : vector<1x1x128xi32> to vector<8x8x128xi32>
    %14 = vector.broadcast %c128_i32 : i32 to vector<8x8x128xi32>
    %15 = arith.select %11, %13, %14 : vector<8x8x128xi1>, vector<8x8x128xi32>
    %cst_6 = arith.constant dense<2147483647> : vector<8x8xi32>
    %16 = vector.multi_reduction <minsi>, %15, %cst_6 [2] : vector<8x8x128xi32> to vector<8x8xi32>
    %17 = vector.shape_cast %16 : vector<8x8xi32> to vector<8x8x1xi32>
    %18 = vector.broadcast %7 : vector<1x1x128xi32> to vector<8x8x128xi32>
    %19 = vector.broadcast %17 : vector<8x8x1xi32> to vector<8x8x128xi32>
    %20 = arith.cmpi eq, %18, %19 : vector<8x8x128xi32>
    %21 = arith.extui %20 : vector<8x8x128xi1> to vector<8x8x128xi32>
    %22 = arith.sitofp %21 : vector<8x8x128xi32> to vector<8x8x128xf32>
    %23 = vector.shape_cast %22 : vector<8x8x128xf32> to vector<64x128xf32>
    %cst_7 = arith.constant dense<0.000000e+00> : vector<64x32xf32>
    %24 = tpu.matmul %23, %1, %cst_7 {dimension_numbers = #tpu.dot_dimension_numbers<[1], [0], [0], [1], [0, 0, 1, 1], [], []>} : vector<64x128xf32>, vector<128x32xf32>, vector<64x32xf32> -> vector<64x32xf32>
    %c0_8 = arith.constant 0 : index
    %c0_9 = arith.constant 0 : index
    %25 = vector.load %arg4[%c0_8, %c0_9] : memref<64x32xf32, #tpu.memory_space<vmem>>, vector<64x32xf32>
    tpu.vector_store %arg4[%c0_8, %c0_9], %24 {strides = array<i32>} : memref<64x32xf32, #tpu.memory_space<vmem>>, vector<64x32xf32>,
    %c0_10 = arith.constant 0 : index
    %c0_11 = arith.constant 0 : index
    %26 = vector.load %arg5[%c0_10, %c0_11] : memref<8x8xi32, #tpu.memory_space<vmem>>, vector<8x8xi32>
    tpu.vector_store %arg5[%c0_10, %c0_11], %16 {strides = array<i32>} : memref<8x8xi32, #tpu.memory_space<vmem>>, vector<8x8xi32>,
    return
  }
  func.func @transform_0(%arg0: i32) -> (i32, i32) {
    %c0_i32 = arith.constant 0 : i32
    %c0_i32_0 = arith.constant 0 : i32
    return %arg0, %c0_i32 : i32, i32
  }
  func.func @transform_1(%arg0: i32) -> (i32, i32) {
    %c0_i32 = arith.constant 0 : i32
    %c0_i32_0 = arith.constant 0 : i32
    %c0_i32_1 = arith.constant 0 : i32
    return %c0_i32, %c0_i32_0 : i32, i32
  }
  func.func @transform_2(%arg0: i32) -> (i32, i32) {
    %c0_i32 = arith.constant 0 : i32
    %c0_i32_0 = arith.constant 0 : i32
    %c0_i32_1 = arith.constant 0 : i32
    return %c0_i32, %c0_i32_0 : i32, i32
  }
  func.func @transform_3(%arg0: i32) -> (i32, i32) {
    %c0_i32 = arith.constant 0 : i32
    %c0_i32_0 = arith.constant 0 : i32
    return %arg0, %c0_i32 : i32, i32
  }
  func.func @transform_4(%arg0: i32) -> (i32, i32) {
    %c0_i32 = arith.constant 0 : i32
    %c0_i32_0 = arith.constant 0 : i32
    return %arg0, %c0_i32 : i32, i32
  }
}

</mosaic_0001>

<bundles_post_ra>
// kernel: tpu_custom_call.1
= control target key start
LH: loop header
LB: loop body
LE: loop exit
PB: predicated region body
PF: predicated region fallthrough
CT: control target
= control target key end

     0   :  { %10 = vsyncpa [#allocation3], 0  ;;  %s792_s0 = inlined_call_operand.vmem [shape: f32[32,32], index: 0, kind: input, shape index: {}]   ;;  %s793_s1 = inlined_call_operand.vmem [shape: f32[128,32], index: 1, kind: input, shape index: {}]   ;;  %s794_s2 = inlined_call_operand.vmem [shape: f32[1,128], index: 2, kind: input, shape index: {}]   ;;  %s795_s3 = inlined_call_operand.hbm [shape: f32[32,32], index: 3, kind: output, shape index: {0}]   ;;  %s796_s4 = inlined_call_operand.hbm [shape: s32[8,8], index: 4, kind: output, shape index: {1}]  }
   0x1   :  { %11 = vsyncpa [#allocation5], 0  ;;  %v41_v0 = vld [vmem:[%s793_s1 + $0x78] sm:$0xff]  ;;  %vm42_vm0 = vcmask 261120   ;;  %v40_v1 = vld [vmem:[%s793_s1 + $0x70] sm:$0xff]  ;;  %v168_v39 = vlaneseq }
   0x2   :  { %445 = vmatpush.xpose.msk.msra.mxu0 %vm42_vm0, %v41_v0  ;;  %485 = vmatpush.xpose.msk.msra.mxu2 %vm42_vm0, %v41_v0  ;;  %v39_v2 = vld [vmem:[%s793_s1 + $0x68] sm:$0xff]  ;;  %v38_v3 = vld [vmem:[%s793_s1 + $0x60] sm:$0xff]  ;;  %v37_v4 = vld [vmem:[%s793_s1 + $0x58] sm:$0xff] }
   0x3   :  { %486 = vmatpush.xpose.msk.msra.mxu3 %vm42_vm0, %v41_v0  ;;  %338 = vmatpush.msra.mxu1 %v41_v0  ;;  %v36_v5 = vld [vmem:[%s793_s1 + $0x50] sm:$0xff]  ;;  %v35_v6 = vld [vmem:[%s793_s1 + $0x48] sm:$0xff]  ;;  %v34_v7 = vld [vmem:[%s793_s1 + $0x40] sm:$0xff]  ;;  %v736_v40 = vand.u32 127, %v168_v39 }
   0x4   :  { %v33_v8 = vld [vmem:[%s793_s1 + $0x38] sm:$0xff]  ;;  %v32_v9 = vld [vmem:[%s793_s1 + $0x30] sm:$0xff]  ;;  %v31_v10 = vld [vmem:[%s793_s1 + $0x28] sm:$0xff] }
   0x5   :  { %339 = vmatpush.msra.mxu1 %v40_v1  ;;  %v30_v11 = vld [vmem:[%s793_s1 + $0x20] sm:$0xff]  ;;  %v29_v12 = vld [vmem:[%s793_s1 + $0x18] sm:$0xff]  ;;  %v28_v13 = vld [vmem:[%s793_s1 + $0x10] sm:$0xff] }
   0x6   :  { %446 = vmatpush.xpose.msk.msra.mxu0 %vm42_vm0, %v40_v1  ;;  %487 = vmatpush.xpose.msk.msra.mxu2 %vm42_vm0, %v40_v1  ;;  %v27_v14 = vld [vmem:[%s793_s1 + $0x8] sm:$0xff]  ;;  %v26_v15 = vld [vmem:[%s793_s1] sm:$0xff]  ;;  %v20_v19 = vld [vmem:[%s792_s0 + $0x10] sm:$0xff] }
   0x7   :  { %488 = vmatpush.xpose.msk.msra.mxu3 %vm42_vm0, %v40_v1  ;;  %340 = vmatpush.msra.mxu1 %v39_v2  ;;  %v18_v16 = vld [vmem:[%s792_s0] sm:$0xff]  ;;  %v19_v17 = vld [vmem:[%s792_s0 + $0x8] sm:$0xff]  ;;  %v21_v21 = vld [vmem:[%s792_s0 + $0x18] sm:$0xff] }
   0x8   :  { %v22_v18 = vld [vmem:[%s792_s0 + $0x20] sm:$0xff]  ;;  %v23_v20 = vld [vmem:[%s792_s0 + $0x28] sm:$0xff]  ;;  %v24_v22 = vld [vmem:[%s792_s0 + $0x30] sm:$0xff] }
   0x9   :  { %341 = vmatpush.msra.mxu1 %v38_v3  ;;  %v25_v23 = vld [vmem:[%s792_s0 + $0x38] sm:$0xff]  ;;  %v522_v24 = vld [vmem:[%s794_s2] ss:$0 sm:$0xff] }
   0xa   :  { %447 = vmatpush.xpose.msk.msra.mxu0 %vm42_vm0, %v39_v2  ;;  %489 = vmatpush.xpose.msk.msra.mxu2 %vm42_vm0, %v39_v2 }
   0xb   :  { %490 = vmatpush.xpose.msk.msra.mxu3 %vm42_vm0, %v39_v2  ;;  %342 = vmatpush.msra.mxu1 %v37_v4 }
   0xd   :  { %343 = vmatpush.msra.mxu1 %v36_v5 }
   0xe   :  { %448 = vmatpush.xpose.msk.msra.mxu0 %vm42_vm0, %v38_v3  ;;  %491 = vmatpush.xpose.msk.msra.mxu2 %vm42_vm0, %v38_v3 }
   0xf   :  { %492 = vmatpush.xpose.msk.msra.mxu3 %vm42_vm0, %v38_v3  ;;  %344 = vmatpush.msra.mxu1 %v35_v6 }
  0x11   :  { %345 = vmatpush.msra.mxu1 %v34_v7 }
  0x12   :  { %449 = vmatpush.xpose.msk.msra.mxu0 %vm42_vm0, %v37_v4  ;;  %493 = vmatpush.xpose.msk.msra.mxu2 %vm42_vm0, %v37_v4 }
  0x13   :  { %494 = vmatpush.xpose.msk.msra.mxu3 %vm42_vm0, %v37_v4  ;;  %346 = vmatpush.msra.mxu1 %v33_v8 }
  0x15   :  { %347 = vmatpush.msra.mxu1 %v32_v9 }
  0x16   :  { %450 = vmatpush.xpose.msk.msra.mxu0 %vm42_vm0, %v36_v5  ;;  %495 = vmatpush.xpose.msk.msra.mxu2 %vm42_vm0, %v36_v5 }
  0x17   :  { %496 = vmatpush.xpose.msk.msra.mxu3 %vm42_vm0, %v36_v5  ;;  %348 = vmatpush.msra.mxu1 %v31_v10 }
  0x19   :  { %349 = vmatpush.msra.mxu1 %v30_v11 }
  0x1a   :  { %451 = vmatpush.xpose.msk.msra.mxu0 %vm42_vm0, %v35_v6  ;;  %497 = vmatpush.xpose.msk.msra.mxu2 %vm42_vm0, %v35_v6 }
  0x1b   :  { %498 = vmatpush.xpose.msk.msra.mxu3 %vm42_vm0, %v35_v6  ;;  %350 = vmatpush.msra.mxu1 %v29_v12 }
  0x1d   :  { %351 = vmatpush.msra.mxu1 %v28_v13 }
  0x1e   :  { %452 = vmatpush.xpose.msk.msra.mxu0 %vm42_vm0, %v34_v7  ;;  %499 = vmatpush.xpose.msk.msra.mxu2 %vm42_vm0, %v34_v7 }
  0x1f   :  { %500 = vmatpush.xpose.msk.msra.mxu3 %vm42_vm0, %v34_v7  ;;  %352 = vmatpush.msra.mxu1 %v27_v14 }
  0x21   :  { %353 = vmatpush.msra.mxu1 %v26_v15 }
  0x22   :  { %453 = vmatpush.xpose.msk.msra.mxu0 %vm42_vm0, %v33_v8  ;;  %501 = vmatpush.xpose.msk.msra.mxu2 %vm42_vm0, %v33_v8 }
  0x23   :  { %502 = vmatpush.xpose.msk.msra.mxu3 %vm42_vm0, %v33_v8 }
  0x26   :  { %454 = vmatpush.xpose.msk.msra.mxu0 %vm42_vm0, %v32_v9  ;;  %503 = vmatpush.xpose.msk.msra.mxu2 %vm42_vm0, %v32_v9 }
  0x27   :  { %504 = vmatpush.xpose.msk.msra.mxu3 %vm42_vm0, %v32_v9 }
  0x2a   :  { %455 = vmatpush.xpose.msk.msra.mxu0 %vm42_vm0, %v31_v10  ;;  %505 = vmatpush.xpose.msk.msra.mxu2 %vm42_vm0, %v31_v10 }
  0x2b   :  { %506 = vmatpush.xpose.msk.msra.mxu3 %vm42_vm0, %v31_v10 }
  0x2e   :  { %456 = vmatpush.xpose.msk.msra.mxu0 %vm42_vm0, %v30_v11  ;;  %507 = vmatpush.xpose.msk.msra.mxu2 %vm42_vm0, %v30_v11 }
  0x2f   :  { %508 = vmatpush.xpose.msk.msra.mxu3 %vm42_vm0, %v30_v11 }
  0x32   :  { %457 = vmatpush.xpose.msk.msra.mxu0 %vm42_vm0, %v29_v12  ;;  %509 = vmatpush.xpose.msk.msra.mxu2 %vm42_vm0, %v29_v12 }
  0x33   :  { %510 = vmatpush.xpose.msk.msra.mxu3 %vm42_vm0, %v29_v12 }
  0x36   :  { %458 = vmatpush.xpose.msk.msra.mxu0 %vm42_vm0, %v28_v13  ;;  %511 = vmatpush.xpose.msk.msra.mxu2 %vm42_vm0, %v28_v13 }
  0x37   :  { %512 = vmatpush.xpose.msk.msra.mxu3 %vm42_vm0, %v28_v13 }
  0x3a   :  { %459 = vmatpush.xpose.msk.msra.mxu0 %vm42_vm0, %v27_v14  ;;  %513 = vmatpush.xpose.msk.msra.mxu2 %vm42_vm0, %v27_v14 }
  0x3b   :  { %514 = vmatpush.xpose.msk.msra.mxu3 %vm42_vm0, %v27_v14 }
  0x3e   :  { %460 = vmatpush.xpose.msk.msra.mxu0 %vm42_vm0, %v26_v15  ;;  %515 = vmatpush.xpose.msk.msra.mxu2 %vm42_vm0, %v26_v15 }
  0x3f   :  { %516 = vmatpush.xpose.msk.msra.mxu3 %vm42_vm0, %v26_v15 }
  0x41   :  { %461 = vmatmul.msk.f32.vlgmr.msra.gmra.mxu0 %vm42_vm0, %v18_v16  ;;  %462 = vmatmul.msk.f32.vlgmr.msra.gmra.mxu2 %vm42_vm0, %v19_v17 }
  0x42   :  { %465 = vmatmul.msk.f32.vlgmr.msra.gmra.mxu3 %vm42_vm0, %v22_v18 }
  0x49   :  { %463 = vmatmul.msk.f32.gmra.mxu2 %vm42_vm0, %v20_v19 }
  0x4a   :  { %466 = vmatmul.msk.f32.gmra.mxu3 %vm42_vm0, %v23_v20 }
  0x51   :  { %464 = vmatmul.msk.f32.gmra.mxu2 %vm42_vm0, %v21_v21 }
  0x52   :  { %467 = vmatmul.msk.f32.gmra.mxu3 %vm42_vm0, %v24_v22 }
  0x5a   :  { %468 = vmatmul.msk.f32.gmra.mxu3 %vm42_vm0, %v25_v23 }
  0xbe   :  { %v132_v25 = vpop.f32.mrf.mxu0 }
  0xbf   :  { %v160_v26 = vsub.f32 %v132_v25, %v522_v24 }
  0xc1   :  { %170 = vmax.xlane.f32.xlu0 %v160_v26 }
  0xc4   :  { %v135_v27 = vpop.f32.mrf.mxu2 }
  0xc5   :  { %v161_v28 = vsub.f32 %v135_v27, %v522_v24  ;;  %v144_v29 = vpop.f32.mrf.mxu3 }
  0xc6   :  { %v164_v30 = vsub.f32 %v144_v29, %v522_v24 }
  0xc8   :  { %178 = vmax.xlane.f32.xlu2 %v164_v30 }
  0xc9   :  { %172 = vmax.xlane.f32.xlu0 %v161_v28 }
  0xcc   :  { %v138_v31 = vpop.f32.mrf.mxu2 }
  0xcd   :  { %v162_v32 = vsub.f32 %v138_v31, %v522_v24  ;;  %v147_v33 = vpop.f32.mrf.mxu3 }
  0xce   :  { %v165_v34 = vsub.f32 %v147_v33, %v522_v24 }
  0xcf   :  { %174 = vmax.xlane.f32.xlu1 %v162_v32 }
  0xd0   :  { %180 = vmax.xlane.f32.xlu2 %v165_v34 }
  0xd4   :  { %v141_v35 = vpop.f32.mrf.mxu2 }
  0xd5   :  { %v163_v36 = vsub.f32 %v141_v35, %v522_v24  ;;  %v150_v37 = vpop.f32.mrf.mxu3 }
  0xd6   :  { %v166_v38 = vsub.f32 %v150_v37, %v522_v24 }
  0xd7   :  { %176 = vmax.xlane.f32.xlu1 %v163_v36 }
  0xdd   :  { %v153_v47 = vpop.f32.mrf.mxu3 }
  0xde   :  { %v167_v49 = vsub.f32 %v153_v47, %v522_v24 }
  0xdf   :  { %182 = vmax.xlane.f32.xlu1 %v166_v38 }
 0x134   :  { %v171_v41 = vpop.xlane.xlu0 %170 }
 0x135   :  { %vm186_vm1 = vcmp.eq.f32.partialorder %v160_v26, %v171_v41 }
 0x136   :  { %v194_v42 = vsel %vm186_vm1, %v736_v40, 128 }
 0x137   :  { %v203_v43 = vshra.s32 %v194_v42, 16  ;;  %v202_v7 = vand.u32 65535, %v194_v42 }
 0x139   :  { %v205_v44 = vcvt.s32.f32 %v203_v43  ;;  %v204_v9 = vcvt.s32.f32 %v202_v7 }
 0x13b   :  { %v179_v45 = vpop.xlane.xlu2 %178  ;;  %206 = vmin.xlane.f32.xlu0 %v205_v44 }
 0x13c   :  { %v173_v46 = vpop.xlane.xlu0 %172  ;;  %vm190_vm3 = vcmp.eq.f32.partialorder %v164_v30, %v179_v45 }
 0x13d   :  { %vm187_vm2 = vcmp.eq.f32.partialorder %v161_v28, %v173_v46  ;;  %v198_v52 = vsel %vm190_vm3, %v736_v40, 128  ;;  %v575_v46 = vmov 1.0  }
 0x13e   :  { %v195_v48 = vsel %vm187_vm2, %v736_v40, 128  ;;  %v259_v57 = vshra.s32 %v198_v52, 16  ;;  %v258_v22 = vand.u32 65535, %v198_v52  ;;  %vm395_vm2 = vcmask 1041409  }
 0x13f   :  { %v217_v50 = vshra.s32 %v195_v48, 16  ;;  %v216_v11 = vand.u32 65535, %v195_v48 }
 0x140   :  { %v261_v60 = vcvt.s32.f32 %v259_v57  ;;  %v260_v27 = vcvt.s32.f32 %v258_v22 }
 0x141   :  { %v219_v51 = vcvt.s32.f32 %v217_v50  ;;  %v218_v14 = vcvt.s32.f32 %v216_v11 }
 0x142   :  { %v175_v53 = vpop.xlane.xlu1 %174 }
 0x143   :  { %v181_v54 = vpop.xlane.xlu2 %180  ;;  %vm188_vm4 = vcmp.eq.f32.partialorder %v162_v32, %v175_v53  ;;  %184 = vmax.xlane.f32.xlu0 %v167_v49  ;;  %220 = vmin.xlane.f32.xlu2 %v219_v51 }
 0x144   :  { %v196_v55 = vsel %vm188_vm4, %v736_v40, 128  ;;  %vm191_vm5 = vcmp.eq.f32.partialorder %v165_v34, %v181_v54 }
 0x145   :  { %v231_v56 = vshra.s32 %v196_v55, 16  ;;  %v199_v59 = vsel %vm191_vm5, %v736_v40, 128  ;;  %v230_v15 = vand.u32 65535, %v196_v55  ;;  %vm397_vm5 = vcmask 1042434  }
 0x146   :  { %v273_v62 = vshra.s32 %v199_v59, 16  ;;  %v272_v25 = vand.u32 65535, %v199_v59 }
 0x147   :  { %v233_v58 = vcvt.s32.f32 %v231_v56  ;;  %v232_v21 = vcvt.s32.f32 %v230_v15 }
 0x148   :  { %v275_v1 = vcvt.s32.f32 %v273_v62  ;;  %v274_v31 = vcvt.s32.f32 %v272_v25 }
 0x149   :  { %234 = vmin.xlane.f32.xlu1 %v233_v58 }
 0x14a   :  { %v177_v61 = vpop.xlane.xlu1 %176 }
 0x14b   :  { %vm189_vm6 = vcmp.eq.f32.partialorder %v163_v36, %v177_v61  ;;  %262 = vmin.xlane.f32.xlu0 %v261_v60 }
 0x14c   :  { %v197_v63 = vsel %vm189_vm6, %v736_v40, 128 }
 0x14d   :  { %v245_v0 = vshra.s32 %v197_v63, 16  ;;  %v244_v26 = vand.u32 65535, %v197_v63 }
 0x14f   :  { %v247_v2 = vcvt.s32.f32 %v245_v0  ;;  %v246_v32 = vcvt.s32.f32 %v244_v26 }
 0x151   :  { %276 = vmin.xlane.f32.xlu1 %v275_v1  ;;  %248 = vmin.xlane.f32.xlu2 %v247_v2 }
 0x152   :  { %v183_v3 = vpop.xlane.xlu1 %182 }
 0x153   :  { %vm192_vm7 = vcmp.eq.f32.partialorder %v166_v38, %v183_v3 }
 0x154   :  { %v200_v4 = vsel %vm192_vm7, %v736_v40, 128  ;;  %vm399_vm7 = vcmask 1043459  }
 0x155   :  { %v287_v5 = vshra.s32 %v200_v4, 16  ;;  %v286_v35 = vand.u32 65535, %v200_v4 }
 0x157   :  { %v289_v6 = vcvt.s32.f32 %v287_v5  ;;  %v288_v37 = vcvt.s32.f32 %v286_v35 }
 0x159   :  { %290 = vmin.xlane.f32.xlu0 %v289_v6 }
 0x1ae   :  { %v207_v8 = vpop.xlane.xlu0 %206 }
 0x1af   :  { %vm208_vm8 = vcmp.eq.f32.partialorder %v205_v44, %v207_v8  ;;  %v213_v39 = vcvt.f32.s32 %v207_v8 }
 0x1b0   :  { %v209_v10 = vsel %vm208_vm8, %v204_v9, inf  ;;  %vm401_vm8 = vcmask 1044484  }
 0x1b1   :  { %210 = vmin.xlane.f32.xlu2 %v209_v10  ;;  %v214_v42 = vshll.u32 %v213_v39, 16 }
 0x1b6   :  { %v221_v12 = vpop.xlane.xlu2 %220  ;;  %v185_v13 = vpop.xlane.xlu0 %184 }
 0x1b7   :  { %vm193_vm9 = vcmp.eq.f32.partialorder %v167_v49, %v185_v13  ;;  %vm222_vm10 = vcmp.eq.f32.partialorder %v219_v51, %v221_v12  ;;  %v227_v45 = vcvt.f32.s32 %v221_v12 }
 0x1b8   :  { %v201_v16 = vsel %vm193_vm9, %v736_v40, 128  ;;  %v223_v17 = vsel %vm222_vm10, %v218_v14, inf  ;;  %vm403_vm9 = vcmask 1045509  }
 0x1b9   :  { %224 = vmin.xlane.f32.xlu1 %v223_v17  ;;  %v301_v18 = vshra.s32 %v201_v16, 16  ;;  %v300_v47 = vand.u32 65535, %v201_v16  ;;  %v228_v49 = vshll.u32 %v227_v45, 16 }
 0x1bb   :  { %v303_v19 = vcvt.s32.f32 %v301_v18  ;;  %v302_v54 = vcvt.s32.f32 %v300_v47 }
 0x1bc   :  { %v235_v20 = vpop.xlane.xlu1 %234 }
 0x1bd   :  { %304 = vmin.xlane.f32.xlu2 %v303_v19  ;;  %vm236_vm11 = vcmp.eq.f32.partialorder %v233_v58, %v235_v20  ;;  %v241_v51 = vcvt.f32.s32 %v235_v20 }
 0x1be   :  { %v746_v23 = vpop.xlane.xlu0 %262  ;;  %v237_v24 = vsel %vm236_vm11, %v232_v21, inf  ;;  %vm405_vm11 = vcmask 1046534  }
 0x1bf   :  { %238 = vmin.xlane.f32.xlu0 %v237_v24  ;;  %vm264_vm12 = vcmp.eq.f32.partialorder %v261_v60, %v746_v23  ;;  %v242_v59 = vshll.u32 %v241_v51, 16  ;;  %v269_v63 = vcvt.f32.s32 %v746_v23 }
 0x1c0   :  { %v265_v30 = vsel %vm264_vm12, %v260_v27, inf }
 0x1c4   :  { %v277_v28 = vpop.xlane.xlu1 %276  ;;  %v249_v29 = vpop.xlane.xlu2 %248 }
 0x1c5   :  { %266 = vmin.xlane.f32.xlu2 %v265_v30  ;;  %vm278_vm13 = vcmp.eq.f32.partialorder %v275_v1, %v277_v28  ;;  %vm250_vm14 = vcmp.eq.f32.partialorder %v247_v2, %v249_v29  ;;  %v283_v0 = vcvt.f32.s32 %v277_v28  ;;  %v255_v1 = vcvt.f32.s32 %v249_v29 }
 0x1c6   :  { %v279_v33 = vsel %vm278_vm13, %v274_v31, inf  ;;  %v251_v34 = vsel %vm250_vm14, %v246_v32, inf }
 0x1c7   :  { %280 = vmin.xlane.f32.xlu0 %v279_v33  ;;  %252 = vmin.xlane.f32.xlu1 %v251_v34  ;;  %v284_v9 = vshll.u32 %v283_v0, 16  ;;  %v256_v10 = vshll.u32 %v255_v1, 16 }
 0x1cc   :  { %v749_v36 = vpop.xlane.xlu0 %290 }
 0x1cd   :  { %vm292_vm15 = vcmp.eq.f32.partialorder %v289_v6, %v749_v36  ;;  %v270_v6 = vshll.u32 %v269_v63, 16  ;;  %v297_v16 = vcvt.f32.s32 %v749_v36 }
 0x1ce   :  { %v293_v38 = vsel %vm292_vm15, %v288_v37, inf  ;;  %vm407_vm15 = vcmask 1047559  }
 0x1cf   :  { %294 = vmin.xlane.f32.xlu1 %v293_v38  ;;  %v298_v23 = vshll.u32 %v297_v16, 16 }
 0x224   :  { %v211_v41 = vpop.xlane.xlu2 %210 }
 0x225   :  { %v212_v43 = vcvt.f32.s32 %v211_v41 }
 0x227   :  { %v215_v44 = vadd.s32 %v214_v42, %v212_v43 }
 0x229   :  { %vm314_vm1 = vcmp.eq.s32.totalorder %v736_v40, %v215_v44  ;;  %v387_v55 = vperm.slane %v215_v44, %v736_v40 }
 0x22a   :  { %477 = vmatmul.msk.f32.vlgmr.msra.gmra.mxu1 %vm314_vm1, %v575_v46  ;;  %vm409_vm1 = vcmask 64512  }
 0x22c   :  { %v225_v48 = vpop.xlane.xlu1 %224 }
 0x22d   :  { %v226_v50 = vcvt.f32.s32 %v225_v48 }
 0x22f   :  { %v229_v52 = vadd.s32 %v228_v49, %v226_v50 }
 0x230   :  { %v305_v53 = vpop.xlane.xlu2 %304 }
 0x231   :  { %v388_v56 = vperm.slane %v229_v52, %v736_v40  ;;  %vm315_vm3 = vcmp.eq.s32.totalorder %v736_v40, %v229_v52  ;;  %vm306_vm4 = vcmp.eq.f32.partialorder %v303_v19, %v305_v53  ;;  %v311_v29 = vcvt.f32.s32 %v305_v53 }
 0x232   :  { %478 = vmatmul.msk.f32.gmra.mxu1 %vm315_vm3, %v575_v46  ;;  %v239_v57 = vpop.xlane.xlu0 %238  ;;  %v307_v58 = vsel %vm306_vm4, %v302_v54, inf }
 0x233   :  { %v396_v60 = vsel %vm395_vm2, %v388_v56, %v387_v55  ;;  %v240_v61 = vcvt.f32.s32 %v239_v57  ;;  %308 = vmin.xlane.f32.xlu2 %v307_v58  ;;  %v312_v31 = vshll.u32 %v311_v29, 16 }
 0x235   :  { %v243_v62 = vadd.s32 %v242_v59, %v240_v61 }
 0x237   :  { %v389_v2 = vperm.slane %v243_v62, %v736_v40  ;;  %vm316_vm6 = vcmp.eq.s32.totalorder %v736_v40, %v243_v62 }
 0x238   :  { %v267_v3 = vpop.xlane.xlu2 %266 }
 0x239   :  { %v398_v4 = vsel %vm397_vm5, %v389_v2, %v396_v60  ;;  %v268_v5 = vcvt.f32.s32 %v267_v3 }
 0x23a   :  { %v253_v7 = vpop.xlane.xlu1 %252  ;;  %479 = vmatmul.msk.f32.gmra.mxu1 %vm316_vm6, %v575_v46  ;;  %v281_v8 = vpop.xlane.xlu0 %280 }
 0x23b   :  { %v254_v11 = vcvt.f32.s32 %v253_v7  ;;  %v282_v12 = vcvt.f32.s32 %v281_v8  ;;  %v271_v13 = vadd.s32 %v270_v6, %v268_v5 }
 0x23d   :  { %v257_v14 = vadd.s32 %v256_v10, %v254_v11  ;;  %v285_v15 = vadd.s32 %v284_v9, %v282_v12  ;;  %v391_v18 = vperm.slane %v271_v13, %v736_v40  ;;  %vm318_vm12 = vcmp.eq.s32.totalorder %v736_v40, %v271_v13 }
 0x23f   :  { %v390_v17 = vperm.slane %v257_v14, %v736_v40  ;;  %v392_v20 = vperm.slane %v285_v15, %v736_v40  ;;  %vm317_vm10 = vcmp.eq.s32.totalorder %v736_v40, %v257_v14  ;;  %vm319_vm13 = vcmp.eq.s32.totalorder %v736_v40, %v285_v15 }
 0x241   :  { %v400_v19 = vsel %vm399_vm7, %v390_v17, %v398_v4 }
 0x242   :  { %v402_v21 = vsel %vm401_vm8, %v391_v18, %v400_v19  ;;  %v295_v22 = vpop.xlane.xlu1 %294  ;;  %480 = vmatmul.msk.f32.gmra.mxu1 %vm317_vm10, %v575_v46 }
 0x243   :  { %v404_v24 = vsel %vm403_vm9, %v392_v20, %v402_v21  ;;  %v296_v25 = vcvt.f32.s32 %v295_v22 }
 0x245   :  { %v299_v26 = vadd.s32 %v298_v23, %v296_v25 }
 0x247   :  { %v393_v27 = vperm.slane %v299_v26, %v736_v40  ;;  %vm320_vm14 = vcmp.eq.s32.totalorder %v736_v40, %v299_v26 }
 0x249   :  { %v406_v28 = vsel %vm405_vm11, %v393_v27, %v404_v24 }
 0x24a   :  { %481 = vmatmul.msk.f32.gmra.mxu1 %vm318_vm12, %v575_v46 }
 0x252   :  { %482 = vmatmul.msk.f32.gmra.mxu1 %vm319_vm13, %v575_v46 }
 0x25a   :  { %483 = vmatmul.msk.f32.gmra.mxu1 %vm320_vm14, %v575_v46 }
 0x2a6   :  { %v309_v30 = vpop.xlane.xlu2 %308 }
 0x2a7   :  { %v310_v32 = vcvt.f32.s32 %v309_v30  ;;  %v355_v33 = vpop.f32.mrf.mxu1 }
 0x2a8   :  { %379 = vst.msk [vmem:[#allocation2] sm:$0xff] %vm42_vm0, %v355_v33 }
 0x2a9   :  { %v313_v34 = vadd.s32 %v312_v31, %v310_v32 }
 0x2ab   :  { %v394_v35 = vperm.slane %v313_v34, %v736_v40  ;;  %vm321_vm2 = vcmp.eq.s32.totalorder %v736_v40, %v313_v34 }
 0x2ac   :  { %484 = vmatmul.msk.f32.gmra.mxu1 %vm321_vm2, %v575_v46 }
 0x2ad   :  { %v408_v36 = vsel %vm407_vm15, %v394_v35, %v406_v28 }
 0x2ae   :  { %410 = vst.msk [vmem:[#allocation4] sm:$0xff] %vm409_vm1, %v408_v36 }
 0x2af   :  { %v358_v37 = vpop.f32.mrf.mxu1 }
 0x2b0   :  { %380 = vst.msk [vmem:[#allocation2 + $0x8] sm:$0xff] %vm42_vm0, %v358_v37 }
 0x2b7   :  { %v361_v38 = vpop.f32.mrf.mxu1 }
 0x2b8   :  { %381 = vst.msk [vmem:[#allocation2 + $0x10] sm:$0xff] %vm42_vm0, %v361_v38 }
 0x2bf   :  { %v364_v39 = vpop.f32.mrf.mxu1 }
 0x2c0   :  { %382 = vst.msk [vmem:[#allocation2 + $0x18] sm:$0xff] %vm42_vm0, %v364_v39 }
 0x2c7   :  { %v367_v41 = vpop.f32.mrf.mxu1 }
 0x2c8   :  { %383 = vst.msk [vmem:[#allocation2 + $0x20] sm:$0xff] %vm42_vm0, %v367_v41 }
 0x2cf   :  { %v370_v42 = vpop.f32.mrf.mxu1 }
 0x2d0   :  { %384 = vst.msk [vmem:[#allocation2 + $0x28] sm:$0xff] %vm42_vm0, %v370_v42 }
 0x2d7   :  { %v373_v40 = vpop.f32.mrf.mxu1 }
 0x2d8   :  { %385 = vst.msk [vmem:[#allocation2 + $0x30] sm:$0xff] %vm42_vm0, %v373_v40 }
 0x329   :  { %v376_v43 = vpop.f32.mrf.mxu1 }
 0x32a   :  { %386 = vst.msk [vmem:[#allocation2 + $0x38] sm:$0xff] %vm42_vm0, %v376_v43 }
 0x32b   :  { %414 = vsyncadd [#allocation3], 512  ;;  %s417_s12 = sshll.u32 %s795_s3, 4  ;;  %s576_s13 = smov [#allocation2]   ;;  %s418_s12 = int_to_ptr.hbm [resolvable:$true] %s417_s12 }
 0x32c   :  { %s415_s14 = sshll.u32 %s576_s13, 4  ;;  %s577_s15 = smov 128   ;;  %s416_s14 = int_to_ptr.vmem [resolvable:$true] %s415_s14 }
 0x32d   :  { %s578_s16 = smov 8   ;;  %s579_s17 = smov [#allocation4]  }
 0x32e   :  { %423 = dma.vmem_to_hbm [thread:$0]  %s416_s14, 512, %s418_s12, [#allocation3], %s577_s15, %s577_s15, %s578_s16  }
 0x32f   :  { %s429_s18 = sshll.u32 %s579_s17, 4  ;;  %s431_s1 = sshll.u32 %s796_s4, 4  ;;  %s430_s18 = int_to_ptr.vmem [resolvable:$true] %s429_s18  ;;  %s432_s1 = int_to_ptr.hbm [resolvable:$true] %s431_s1 }
 0x330   :  { %434 = dma.vmem_to_hbm [thread:$0]  %s430_s18, 128, %s432_s1, [#allocation5]  }
 0x331   :  { %571 = dma.done.wait [#allocation3], 1024  }
 0x332   :  { %572 = vsyncadd [#allocation3], 4294966272 }
 0x333   :  { %573 = dma.done.wait [#allocation5], 128  }
 0x334   :  { %574 = vsyncadd [#allocation5], 4294967168 }
 0x335   :  { %443 = vsyncpa [#allocation3], 1 }
 0x336   :  { %444 = vsyncpa [#allocation5], 1 }

</bundles_post_ra>
